<compile_context>
chip_gen: v5e
topology: v5e:2x2
jax: 0.10.0
libtpu: 0.0.40
codegen_flags: <defaults>
</compile_context>

<pallas_src>
import functools

import jax
import jax.numpy as jnp
from jax.experimental import pallas as pl
from jax.experimental.pallas import tpu as pltpu


# --------------------------------------------------------------------------
# Per-generation VMEM sizing (v5e/v6e: 128 MiB / core, v7x: 64 MiB / core)
# --------------------------------------------------------------------------
def _vmem_config():
    cap = 64 * 1024 * 1024                       # conservative default (v7x-sized)
    try:
        info = pltpu.get_tpu_info()
        cap = int(getattr(info, "vmem_capacity_bytes", cap) or cap)
    except Exception:
        pass
    limit = min((cap * 3) // 4, 96 * 1024 * 1024)   # explicit Mosaic scoped limit
    budget = (limit * 3) // 4                        # working-set target; headroom
    return budget, limit                             # for Mosaic internal scratch


_VMEM_BUDGET, _VMEM_LIMIT = _vmem_config()
_TM_CAP = 32768                                      # hard cap on rows per grid step


def _round_up(a, b):
    return ((a + b - 1) // b) * b


# --------------------------------------------------------------------------
# Pallas matmul kernel: fused bias (+ residual) + activation epilogue
# --------------------------------------------------------------------------
def _make_mm_kernel(act, has_res):
    """tk == K and tn == N: no accumulator scratch, no K loop.  Each grid step
    computes one (tm, N) output tile in a single MXU pass (bf16 inputs, f32
    accumulation) and applies the epilogue in f32."""

    def kernel(x_ref, w_ref, b_ref, *rest):
        if has_res:
            r_ref, o_ref = rest
        else:
            (o_ref,) = rest
        y = jnp.dot(x_ref[...], w_ref[...], preferred_element_type=jnp.float32)
        y = y + b_ref[...]
        if has_res:
            y = y + r_ref[...].astype(jnp.float32)
        if act == "relu":
            y = jnp.maximum(y, 0.0)
        elif act == "sigmoid":
            # exp() lands on the EUP; exact 1/(1+e) keeps the output in (0, 1).
            y = 1.0 / (1.0 + jnp.exp(-y))
        o_ref[...] = y.astype(o_ref.dtype)

    return kernel


@functools.lru_cache(maxsize=None)
def _build_matmul(Mp, K, N, tm, act, has_res, out_dtype_name):
    out_dtype = jnp.dtype(out_dtype_name)
    in_specs = [
        pl.BlockSpec((tm, K), lambda i: (i, 0)),   # activations / im2col patches
        pl.BlockSpec((K, N), lambda i: (0, 0)),    # weights (resident across grid)
        pl.BlockSpec((1, N), lambda i: (0, 0)),    # bias
    ]
    if has_res:
        in_specs.append(pl.BlockSpec((tm, N), lambda i: (i, 0)))
    call = pl.pallas_call(
        _make_mm_kernel(act, has_res),
        out_shape=jax.ShapeDtypeStruct((Mp, N), out_dtype),
        grid=(Mp // tm,),
        in_specs=in_specs,
        out_specs=pl.BlockSpec((tm, N), lambda i: (i, 0)),
        compiler_params=pltpu.CompilerParams(
            dimension_semantics=("parallel",),
            vmem_limit_bytes=_VMEM_LIMIT,
        ),
    )
    return jax.jit(call)


# --------------------------------------------------------------------------
# Row-tile selection
# --------------------------------------------------------------------------
def _largest_divisor_tile(Ma, cap, min_steps):
    """Largest tm <= cap that divides Ma (prefer multiples of 256, else 16)
    while leaving at least `min_steps` grid steps.  None if nothing decent."""
    for quantum in (256, 16):
        t = (min(cap, Ma // min_steps) // quantum) * quantum
        while t >= quantum:
            if Ma % t == 0:
                return t
            t -= quantum
    return None


def _choose_tiles(M, K, N, out_bytes, has_res):
    """Pick (Mp, tm).  VMEM-budget driven (double-buffered x/out/res tiles,
    resident double-buffered weight, bias, and the f32 dot result), preferring
    tiles that divide M exactly so the wrapper never has to copy a huge patch
    matrix just to pad it, and keeping >= 2 (>= 4 for large M) grid steps for
    DMA pipelining and v7x megacore sharding of the 'parallel' axis."""
    res_b = 2 if has_res else 0
    fixed = 2 * K * N * 2 + 8 * N * 4                        # weight (x2) + bias
    row = 2 * (K * 2 + N * out_bytes + N * res_b) + N * 4    # x/out/res (x2) + f32 acc
    cap = _TM_CAP
    while cap > 256 and fixed + cap * row > _VMEM_BUDGET:
        cap //= 2

    align = 8 if (M % 16 != 0 and M % 8 == 0) else 16
    Ma = _round_up(max(M, align), align)
    if Ma <= min(cap, 512):                      # tiny layer: one step is cheapest
        return Ma, Ma

    min_steps = 4 if Ma >= 4096 else 2
    tm = _largest_divisor_tile(Ma, cap, min_steps)
    if tm is not None and (tm >= 256 or Ma <= 16384):
        return Ma, tm

    # Pathological M (no good divisor): pad up to a multiple of a big tile.
    tm = max(256, min(cap, _round_up(-(-Ma // min_steps), 256)))
    return _round_up(Ma, tm), tm


def matmul_bias_act(x, w, b, residual=None, act="none", out_dtype=jnp.bfloat16):
    """y = act(x @ w + b [+ residual]); bf16 MXU matmul, f32 accumulation."""
    M, K = x.shape
    N = w.shape[1]
    x = x.astype(jnp.bfloat16)
    w = w.astype(jnp.bfloat16)
    b = b.astype(jnp.float32).reshape(1, N)
    has_res = residual is not None

    if K % 8:                                  # only conv1 (K = 7*7*3 = 147); tiny
        kp = (-K) % 8
        x = jnp.pad(x, ((0, 0), (0, kp)))
        w = jnp.pad(w, ((0, kp), (0, 0)))
        K += kp

    out_bytes = jnp.dtype(out_dtype).itemsize
    Mp, tm = _choose_tiles(M, K, N, out_bytes, has_res)
    if Mp != M:                                # rare; only tiny / ragged layers
        x = jnp.pad(x, ((0, Mp - M), (0, 0)))
    args = [x, w, b]
    if has_res:
        r = residual.astype(jnp.bfloat16)
        if Mp != M:
            r = jnp.pad(r, ((0, Mp - M), (0, 0)))
        args.append(r)

    out = _build_matmul(Mp, K, N, tm, act, has_res, jnp.dtype(out_dtype).name)(*args)
    return out[:M] if Mp != M else out


# --------------------------------------------------------------------------
# Conv / ConvTranspose / pooling built on the Pallas matmul
# --------------------------------------------------------------------------
def _extract_patches(x, kh, kw, stride, padding, pad_value=0.0):
    """x: (N,H,W,C) -> (N, oh, ow, kh*kw, C) patches (fused under wrapper jit)."""
    N, H, W, C = x.shape
    sh, sw = stride
    ph, pw = padding
    oh = (H + 2 * ph - kh) // sh + 1
    ow = (W + 2 * pw - kw) // sw + 1
    xp = jnp.pad(x, ((0, 0), (ph, ph), (pw, pw), (0, 0)), constant_values=pad_value)
    cols = []
    for dy in range(kh):
        for dx in range(kw):
            cols.append(
                xp[:, dy: dy + (oh - 1) * sh + 1: sh,
                   dx: dx + (ow - 1) * sw + 1: sw, :]
            )
    patches = jnp.stack(cols, axis=-2)  # (N, oh, ow, kh*kw, C)
    return patches, oh, ow


@functools.partial(jax.jit,
                   static_argnames=("stride", "padding", "act", "out_dtype"))
def conv2d_nhwc(x, w_oihw, bias, *, stride, padding, act="none", residual=None,
                out_dtype=jnp.bfloat16):
    """PyTorch-semantics Conv2d. x: (N,H,W,C) NHWC, w: (O,I,kh,kw)."""
    Nb = x.shape[0]
    O, I, kh, kw = w_oihw.shape
    patches, oh, ow = _extract_patches(x, kh, kw, stride, padding, 0.0)
    patches = patches.reshape(Nb * oh * ow, kh * kw * I)
    # (O,I,kh,kw) -> (kh,kw,I,O) -> (kh*kw*I, O)  matches patch flattening order
    wm = jnp.transpose(w_oihw, (2, 3, 1, 0)).reshape(kh * kw * I, O)
    res2 = None if residual is None else residual.reshape(Nb * oh * ow, O)
    y = matmul_bias_act(patches, wm, bias, residual=res2, act=act,
                        out_dtype=out_dtype)
    return y.reshape(Nb, oh, ow, O)


def _deconv_dim_spec(s):
    """Sub-pixel decomposition of a k=4, p=1 ConvTranspose dimension.

    Returns (pad, window, taps) where taps[phase][window_offset] = kernel index.
    out[s*a + phase] = sum_d x_padded[a + d] * w[taps[phase][d]]
    """
    if s == 2:
        return 1, 3, ({0: 3, 1: 1}, {1: 2, 2: 0})
    if s == 1:
        return 2, 4, ({0: 3, 1: 2, 2: 1, 3: 0},)
    raise NotImplementedError(f"stride {s} not supported")


@functools.partial(jax.jit, static_argnames=("stride", "act", "out_dtype"))
def conv_transpose2d_nhwc(x, w_iohw, bias, *, stride, act="none",
                          out_dtype=jnp.bfloat16):
    """PyTorch ConvTranspose2d(k=4, p=1, stride in {1,2} per dim).

    Lowered as a single stride-1 conv over (win_h, win_w) windows whose output
    columns pack every output phase: (M, win*Cin) @ (win*Cin, n_phases*Cout),
    then phases are interleaved back into the spatial grid (XLA transpose).
    """
    Nb, H, W, I = x.shape
    Iw, O, kh, kw = w_iohw.shape
    assert (kh, kw) == (4, 4) and Iw == I
    sh, sw = stride
    ph, win_h, taps_h = _deconv_dim_spec(sh)
    pw, win_w, taps_w = _deconv_dim_spec(sw)
    nphy, nphx = len(taps_h), len(taps_w)

    patches, oh, ow = _extract_patches(x, win_h, win_w, (1, 1), (ph, pw), 0.0)
    patches = patches.reshape(Nb * oh * ow, win_h * win_w * I)

    # Packed weight: (win_h, win_w, I, nphy, nphx, O) with structural zeros.
    wm = jnp.zeros((win_h, win_w, I, nphy, nphx, O), jnp.float32)
    for py, th in enumerate(taps_h):
        for px, tw in enumerate(taps_w):
            for dy, uy in th.items():
                for dx, ux in tw.items():
                    wm = wm.at[dy, dx, :, py, px, :].set(w_iohw[:, :, uy, ux])
    wm = wm.reshape(win_h * win_w * I, nphy * nphx * O)
    bm = jnp.tile(bias.astype(jnp.float32), nphy * nphx)

    y = matmul_bias_act(patches, wm, bm, act=act, out_dtype=out_dtype)
    y = y.reshape(Nb, oh, ow, nphy, nphx, O)
    y = jnp.transpose(y, (0, 1, 3, 2, 4, 5)).reshape(Nb, oh * nphy, ow * nphx, O)
    return y


@functools.partial(jax.jit, static_argnames=("k", "s", "p"))
def maxpool2d_nhwc(x, *, k=3, s=2, p=1):
    """3x3/s2 max-pool as a bf16 chain of jnp.maximum over shifted strided
    slices; XLA fuses it into a single pass (no 9x patch materialization)."""
    # TODO(synk): could be a Pallas kernel with halo'd row blocks; fused XLA
    #             glue already hits the minimal HBM traffic for this op.
    Nb, H, W, C = x.shape
    oh = (H + 2 * p - k) // s + 1
    ow = (W + 2 * p - k) // s + 1
    neg = jnp.asarray(-jnp.inf, x.dtype)
    xp = jnp.pad(x, ((0, 0), (p, p), (p, p), (0, 0)), constant_values=neg)
    out = None
    for dy in range(k):
        for dx in range(k):
            v = xp[:, dy: dy + (oh - 1) * s + 1: s,
                   dx: dx + (ow - 1) * s + 1: s, :]
            out = v if out is None else jnp.maximum(out, v)
    return out


def fold_bn(w_oihw, bn, eps=1e-5):
    """Exact inference-mode BatchNorm fold into the preceding (bias-free) conv."""
    gamma, beta, mean, var = bn
    scale = gamma / jnp.sqrt(var + eps)
    w_f = w_oihw * scale[:, None, None, None]
    b_f = beta - mean * scale
    return w_f, b_f


# --------------------------------------------------------------------------
# Deterministic parameter construction (ResNet34 + decoder)
# --------------------------------------------------------------------------
class _Rng:
    def __init__(self, key):
        self._key = key

    def next(self):
        self._key, sub = jax.random.split(self._key)
        return sub


def _conv_w(rng, cout, cin, k):
    fan_in = cin * k * k
    return jax.random.normal(rng.next(), (cout, cin, k, k), jnp.float32) * (
        2.0 / fan_in) ** 0.5


def _deconv_w(rng, cin, cout, k):
    fan_in = cin * k * k
    return jax.random.normal(rng.next(), (cin, cout, k, k), jnp.float32) * (
        2.0 / fan_in) ** 0.5


def _bn_p(rng, c):
    gamma = 1.0 + 0.1 * jax.random.normal(rng.next(), (c,), jnp.float32)
    beta = 0.1 * jax.random.normal(rng.next(), (c,), jnp.float32)
    mean = 0.1 * jax.random.normal(rng.next(), (c,), jnp.float32)
    var = jax.random.uniform(rng.next(), (c,), jnp.float32, minval=0.5, maxval=1.5)
    return (gamma, beta, mean, var)


def _make_block(rng, cin, cout, stride):
    p = {
        "conv1": _conv_w(rng, cout, cin, 3),
        "bn1": _bn_p(rng, cout),
        "conv2": _conv_w(rng, cout, cout, 3),
        "bn2": _bn_p(rng, cout),
        "stride": stride,
    }
    if stride != 1 or cin != cout:
        p["ds_conv"] = _conv_w(rng, cout, cin, 1)
        p["ds_bn"] = _bn_p(rng, cout)
    return p


def make_params(key):
    rng = _Rng(key)
    params = {
        "conv1": _conv_w(rng, 64, 3, 7),
        "bn1": _bn_p(rng, 64),
        "blocks": [],
        "decoder": [],
    }
    # ResNet34: [3, 4, 6, 3] BasicBlocks
    cfg = [(64, 3, 1), (128, 4, 2), (256, 6, 2), (512, 3, 2)]
    cin = 64
    for cout, n, stride in cfg:
        for i in range(n):
            params["blocks"].append(
                _make_block(rng, cin, cout, stride if i == 0 else 1))
            cin = cout
    # Decoder: ConvTranspose2d(k=4, p=1) stack, last has stride (1, 2)
    dec_cfg = [
        (512, 256, (2, 2)), (256, 128, (2, 2)), (128, 64, (2, 2)),
        (64, 64, (2, 2)), (64, 64, (2, 2)), (64, 32, (2, 2)),
        (32, 32, (2, 2)), (32, 16, (2, 2)), (16, 8, (2, 2)),
        (8, 3, (1, 2)),
    ]
    for ci, co, st in dec_cfg:
        w = _deconv_w(rng, ci, co, 4)
        b = 0.01 * jax.random.normal(rng.next(), (co,), jnp.float32)
        params["decoder"].append((w, b, st))
    return params


# --------------------------------------------------------------------------
# Forward pass
# --------------------------------------------------------------------------
def basic_block(x, p):
    s = p["stride"]
    w1, b1 = fold_bn(p["conv1"], p["bn1"])
    out = conv2d_nhwc(x, w1, b1, stride=(s, s), padding=(1, 1), act="relu")
    if "ds_conv" in p:
        wd, bd = fold_bn(p["ds_conv"], p["ds_bn"])
        identity = conv2d_nhwc(x, wd, bd, stride=(s, s), padding=(0, 0),
                               act="none")
    else:
        identity = x
    w2, b2 = fold_bn(p["conv2"], p["bn2"])
    # bn2(conv2(out)) + identity, then ReLU -- fused into the matmul epilogue
    return conv2d_nhwc(out, w2, b2, stride=(1, 1), padding=(1, 1), act="relu",
                       residual=identity)


def resnet_autoencoder_forward(x_nchw, params):
    # NCHW -> NHWC, bf16 activations for internal compute
    x = jnp.transpose(x_nchw, (0, 2, 3, 1)).astype(jnp.bfloat16)

    # --- encoder: ResNet34 children[:-1] ---
    w, b = fold_bn(params["conv1"], params["bn1"])
    x = conv2d_nhwc(x, w, b, stride=(2, 2), padding=(3, 3), act="relu")
    x = maxpool2d_nhwc(x, k=3, s=2, p=1)
    for blk in params["blocks"]:
        x = basic_block(x, blk)
    # AdaptiveAvgPool2d((1,1)): mean over spatial dims (jnp glue reduction)
    x = jnp.mean(x.astype(jnp.float32), axis=(1, 2), keepdims=True)
    x = x.astype(jnp.bfloat16)  # (N, 1, 1, 512)

    # --- decoder ---
    n_dec = len(params["decoder"])
    for i, (wt, bt, st) in enumerate(params["decoder"]):
        last = i == n_dec - 1
        x = conv_transpose2d_nhwc(
            x, wt, bt, stride=st,
            act="sigmoid" if last else "relu",
            out_dtype=jnp.float32 if last else jnp.bfloat16)

    # NHWC -> NCHW to match PyTorch output convention
    return jnp.transpose(x, (0, 3, 1, 2))


# --------------------------------------------------------------------------
if __name__ == "__main__":
    key = jax.random.PRNGKey(0)
    pkey, xkey = jax.random.split(key)
    params = make_params(pkey)

    # Small NCHW input; the encoder's adaptive avg-pool makes the latent
    # (N, 512, 1, 1) regardless, and the decoder output is (N, 3, 513, 1024).
    x = jax.random.normal(xkey, (2, 3, 16, 16), jnp.float32)

    y = resnet_autoencoder_forward(x, params)
    y = jax.block_until_ready(y)

    assert y.shape == (2, 3, 513, 1024), y.shape
    assert bool(jnp.all(jnp.isfinite(y)))
    assert bool(jnp.all((y >= 0.0) & (y <= 1.0)))  # sigmoid output range
    print("KERNEL_OK")
</pallas_src>

<mosaic_0001>
module attributes {stable_mosaic.version = 11 : i64} {
  func.func @kernel(%arg0: i32, %arg1: memref<128x152xbf16, #tpu.memory_space<vmem>>, %arg2: memref<152x64xbf16, #tpu.memory_space<vmem>>, %arg3: memref<1x64xf32, #tpu.memory_space<vmem>>, %arg4: memref<128x64xbf16, #tpu.memory_space<vmem>>) attributes {dimension_semantics = [#tpu.dimension_semantics<parallel>], iteration_bounds = array<i64: 1>, scalar_prefetch = 0 : i64, scratch_operands = 0 : i64, tpu.core_type = #tpu.core_type<tc>, window_params = [{transform_indices = @transform_0, window_bounds = array<i64: 128, 152>}, {pipeline_mode = #tpu.pipeline_mode<synchronous>, transform_indices = @transform_1, window_bounds = array<i64: 152, 64>}, {pipeline_mode = #tpu.pipeline_mode<synchronous>, transform_indices = @transform_2, window_bounds = array<i64: 1, 64>}, {transform_indices = @transform_3, window_bounds = array<i64: 128, 64>}]} {
    %c0 = arith.constant 0 : index
    %c0_0 = arith.constant 0 : index
    %0 = vector.load %arg1[%c0, %c0_0] : memref<128x152xbf16, #tpu.memory_space<vmem>>, vector<128x152xbf16>
    %c0_1 = arith.constant 0 : index
    %c0_2 = arith.constant 0 : index
    %1 = vector.load %arg2[%c0_1, %c0_2] : memref<152x64xbf16, #tpu.memory_space<vmem>>, vector<152x64xbf16>
    %cst = arith.constant dense<0.000000e+00> : vector<128x64xf32>
    %2 = tpu.matmul %0, %1, %cst {dimension_numbers = #tpu.dot_dimension_numbers<[1], [0], [0], [1], [0, 0, 1, 1], [], []>} : vector<128x152xbf16>, vector<152x64xbf16>, vector<128x64xf32> -> vector<128x64xf32>
    %c0_3 = arith.constant 0 : index
    %c0_4 = arith.constant 0 : index
    %3 = vector.load %arg3[%c0_3, %c0_4] : memref<1x64xf32, #tpu.memory_space<vmem>>, vector<1x64xf32>
    %4 = vector.broadcast %3 : vector<1x64xf32> to vector<128x64xf32>
    %5 = arith.addf %2, %4 : vector<128x64xf32>
    %cst_5 = arith.constant 0.000000e+00 : f32
    %6 = vector.broadcast %cst_5 : f32 to vector<128x64xf32>
    %7 = arith.maximumf %5, %6 : vector<128x64xf32>
    %8 = arith.truncf %7 : vector<128x64xf32> to vector<128x64xbf16>
    %c0_6 = arith.constant 0 : index
    %c0_7 = arith.constant 0 : index
    %9 = vector.load %arg4[%c0_6, %c0_7] : memref<128x64xbf16, #tpu.memory_space<vmem>>, vector<128x64xbf16>
    tpu.vector_store %arg4[%c0_6, %c0_7], %8 {strides = array<i32>} : memref<128x64xbf16, #tpu.memory_space<vmem>>, vector<128x64xbf16>,
    return
  }
  func.func @transform_0(%arg0: i32) -> (i32, i32) {
    %c0_i32 = arith.constant 0 : i32
    %c0_i32_0 = arith.constant 0 : i32
    return %arg0, %c0_i32 : i32, i32
  }
  func.func @transform_1(%arg0: i32) -> (i32, i32) {
    %c0_i32 = arith.constant 0 : i32
    %c0_i32_0 = arith.constant 0 : i32
    %c0_i32_1 = arith.constant 0 : i32
    return %c0_i32, %c0_i32_0 : i32, i32
  }
  func.func @transform_2(%arg0: i32) -> (i32, i32) {
    %c0_i32 = arith.constant 0 : i32
    %c0_i32_0 = arith.constant 0 : i32
    %c0_i32_1 = arith.constant 0 : i32
    return %c0_i32, %c0_i32_0 : i32, i32
  }
  func.func @transform_3(%arg0: i32) -> (i32, i32) {
    %c0_i32 = arith.constant 0 : i32
    %c0_i32_0 = arith.constant 0 : i32
    return %arg0, %c0_i32 : i32, i32
  }
}

</mosaic_0001>

<bundles_post_ra>
// kernel: tpu_custom_call.1
= control target key start
LH: loop header
LB: loop body
LE: loop exit
PB: predicated region body
PF: predicated region fallthrough
CT: control target
= control target key end

     0   :  { %vm208_vm0 = vcmask 1043456   ;;  %vm183_vm1 = vcmask 195584   ;;  %vm342_vm2 = vcmask 519168   ;;  %s746_s1 = inlined_call_operand.vmem [shape: bf16[152,64], index: 1, kind: input, shape index: {}]   ;;  %s747_s0 = inlined_call_operand.vmem [shape: bf16[128,152], index: 0, kind: input, shape index: {}]   ;;  %s748_s2 = inlined_call_operand.vmem [shape: f32[1,64], index: 2, kind: input, shape index: {}]   ;;  %s749_s3 = inlined_call_operand.vmem [shape: bf16[128,64], index: 3, kind: output, shape index: {}]  }
   0x1   :  { %v494_v0 = vld [vmem:[%s746_s1 + $0x38] sm:$0xff]  ;;  %v49_v1 = vld [vmem:[%s746_s1 + $0x48] sm:$0xf]  ;;  %v493_v3 = vld [vmem:[%s746_s1 + $0x30] sm:$0xff] }
   0x2   :  { %v163_v2 = vunpack.c.l.b16 %v49_v1  ;;  %212 = vmatpush.bf16.msra.mxu0 %v494_v0  ;;  %496 = vmatpush.bf16.msra.mxu2 %v494_v0  ;;  %v495_v6 = vld [vmem:[%s746_s1 + $0x40] sm:$0xff]  ;;  %v492_v7 = vld [vmem:[%s746_s1 + $0x28] sm:$0xff]  ;;  %v481_v10 = vld [vmem:[%s747_s0 + $0x54] sm:$0xf] }
   0x3   :  { %v471_v8 = vld [vmem:[%s747_s0 + $0x4] sm:$0xf]  ;;  %v367_v9 = vld [vmem:[%s747_s0 + $0x8] sm:$0xf0]  ;;  %v407_v11 = vld [vmem:[%s747_s0 + $0x58] sm:$0xf0] }
   0x4   :  { %v173_v4 = vpack.c.b16 %v163_v2, %v163_v2  ;;  %v370_v12 = vor.u32 %v471_v8, %v367_v9  ;;  %v491_v13 = vld [vmem:[%s746_s1 + $0x20] sm:$0xff]  ;;  %v410_v14 = vor.u32 %v481_v10, %v407_v11  ;;  %v490_v15 = vld [vmem:[%s746_s1 + $0x18] sm:$0xff]  ;;  %v489_v16 = vld [vmem:[%s746_s1 + $0x10] sm:$0xff] }
   0x5   :  { %v488_v17 = vld [vmem:[%s746_s1 + $0x8] sm:$0xff]  ;;  %v473_v18 = vld [vmem:[%s747_s0 + $0x14] sm:$0xf]  ;;  %v375_v19 = vld [vmem:[%s747_s0 + $0x18] sm:$0xf0] }
   0x6   :  { %v210_v5 = vsel %vm208_vm0, %v173_v4, 0  ;;  %213 = vmatpush.bf16.msra.mxu0 %v493_v3  ;;  %497 = vmatpush.bf16.msra.mxu2 %v493_v3  ;;  %v483_v20 = vld [vmem:[%s747_s0 + $0x64] sm:$0xf]  ;;  %v415_v21 = vld [vmem:[%s747_s0 + $0x68] sm:$0xf0]  ;;  %v378_v22 = vor.u32 %v473_v18, %v375_v19 }
   0x7   :  { %267 = vmatpush.bf16.msra.mxu1 %v210_v5  ;;  %504 = vmatpush.bf16.msra.mxu3 %v210_v5  ;;  %v487_v23 = vld [vmem:[%s746_s1] sm:$0xff]  ;;  %v472_v25 = vld [vmem:[%s747_s0 + $0x4] sm:$0xf0]  ;;  %v418_v26 = vor.u32 %v483_v20, %v415_v21  ;;  %v383_v32 = vld [vmem:[%s747_s0 + $0x28] sm:$0xf0] }
   0x8   :  { %v365_v24 = vld [vmem:[%s747_s0] sm:$0xf]  ;;  %v480_v28 = vld [vmem:[%s747_s0 + $0x44] sm:$0xf0]  ;;  %v475_v31 = vld [vmem:[%s747_s0 + $0x24] sm:$0xf] }
   0x9   :  { %v397_v27 = vld [vmem:[%s747_s0 + $0x40] sm:$0xf]  ;;  %v366_v29 = vor.u32 %v472_v25, %v365_v24  ;;  %v485_v33 = vld [vmem:[%s747_s0 + $0x74] sm:$0xf]  ;;  %v423_v34 = vld [vmem:[%s747_s0 + $0x78] sm:$0xf0]  ;;  %v386_v35 = vor.u32 %v475_v31, %v383_v32 }
   0xa   :  { %214 = vmatpush.bf16.msra.mxu0 %v492_v7  ;;  %498 = vmatpush.bf16.msra.mxu2 %v492_v7  ;;  %v398_v30 = vor.u32 %v480_v28, %v397_v27  ;;  %v373_v36 = vld [vmem:[%s747_s0 + $0x10] sm:$0xf]  ;;  %v474_v37 = vld [vmem:[%s747_s0 + $0x14] sm:$0xf0]  ;;  %v426_v38 = vor.u32 %v485_v33, %v423_v34  ;;  %v477_v43 = vld [vmem:[%s747_s0 + $0x34] sm:$0xf] }
   0xb   :  { %268 = vmatpush.bf16.msra.mxu1 %v495_v6  ;;  %505 = vmatpush.bf16.msra.mxu3 %v495_v6  ;;  %v405_v39 = vld [vmem:[%s747_s0 + $0x50] sm:$0xf]  ;;  %v482_v40 = vld [vmem:[%s747_s0 + $0x54] sm:$0xf0]  ;;  %v374_v41 = vor.u32 %v474_v37, %v373_v36  ;;  %v391_v44 = vld [vmem:[%s747_s0 + $0x38] sm:$0xf0] }
   0xc   :  { %v406_v42 = vor.u32 %v482_v40, %v405_v39  ;;  %v394_v45 = vor.u32 %v477_v43, %v391_v44  ;;  %v381_v46 = vld [vmem:[%s747_s0 + $0x20] sm:$0xf]  ;;  %v476_v47 = vld [vmem:[%s747_s0 + $0x24] sm:$0xf0]  ;;  %v479_v52 = vld [vmem:[%s747_s0 + $0x44] sm:$0xf] }
   0xd   :  { %v413_v48 = vld [vmem:[%s747_s0 + $0x60] sm:$0xf]  ;;  %v484_v49 = vld [vmem:[%s747_s0 + $0x64] sm:$0xf0]  ;;  %v382_v50 = vor.u32 %v476_v47, %v381_v46  ;;  %v399_v53 = vld [vmem:[%s747_s0 + $0x48] sm:$0xf0] }
   0xe   :  { %463 = vmatmul.msk.bf16.vlgmr.msra.gmra.mxu1 %vm183_vm1, %v370_v12  ;;  %215 = vmatpush.bf16.msra.mxu0 %v491_v13  ;;  %v414_v51 = vor.u32 %v484_v49, %v413_v48  ;;  %v402_v54 = vor.u32 %v479_v52, %v399_v53  ;;  %v389_v55 = vld [vmem:[%s747_s0 + $0x30] sm:$0xf]  ;;  %v478_v56 = vld [vmem:[%s747_s0 + $0x34] sm:$0xf0]  ;;  %v664_v0 = vld [vmem:[%s748_s2] ss:$0 sm:$0xff] }
   0xf   :  { %468 = vmatmul.msk.bf16.vlgmr.msra.gmra.mxu3 %vm183_vm1, %v410_v14  ;;  %499 = vmatpush.bf16.msra.mxu2 %v491_v13  ;;  %v421_v57 = vld [vmem:[%s747_s0 + $0x70] sm:$0xf]  ;;  %v486_v58 = vld [vmem:[%s747_s0 + $0x74] sm:$0xf0]  ;;  %v390_v59 = vor.u32 %v478_v56, %v389_v55 }
  0x10   :  { %v422_v60 = vor.u32 %v486_v58, %v421_v57 }
  0x12   :  { %216 = vmatpush.bf16.msra.mxu0 %v490_v15 }
  0x13   :  { %500 = vmatpush.bf16.msra.mxu2 %v490_v15 }
  0x16   :  { %217 = vmatpush.bf16.msra.mxu0 %v489_v16 }
  0x17   :  { %501 = vmatpush.bf16.msra.mxu2 %v489_v16 }
  0x1a   :  { %218 = vmatpush.bf16.msra.mxu0 %v488_v17 }
  0x1b   :  { %502 = vmatpush.bf16.msra.mxu2 %v488_v17 }
  0x1e   :  { %464 = vmatmul.msk.bf16.gmra.mxu1 %vm183_vm1, %v378_v22  ;;  %219 = vmatpush.bf16.msra.mxu0 %v487_v23 }
  0x1f   :  { %469 = vmatmul.msk.bf16.gmra.mxu3 %vm183_vm1, %v418_v26  ;;  %503 = vmatpush.bf16.msra.mxu2 %v487_v23 }
  0x21   :  { %220 = vmatmul.bf16.vlgmr.msra.gmra.mxu0 %v366_v29 }
  0x22   :  { %240 = vmatmul.bf16.vlgmr.msra.gmra.mxu2 %v398_v30 }
  0x2e   :  { %465 = vmatmul.msk.bf16.gmra.mxu1 %vm183_vm1, %v386_v35 }
  0x2f   :  { %470 = vmatmul.msk.bf16.gmra.mxu3 %vm183_vm1, %v426_v38 }
  0x31   :  { %225 = vmatmul.bf16.gmra.mxu0 %v374_v41 }
  0x32   :  { %245 = vmatmul.bf16.gmra.mxu2 %v406_v42 }
  0x3e   :  { %466 = vmatmul.msk.bf16.gmra.mxu1 %vm183_vm1, %v394_v45 }
  0x41   :  { %230 = vmatmul.bf16.gmra.mxu0 %v382_v50 }
  0x42   :  { %250 = vmatmul.bf16.gmra.mxu2 %v414_v51 }
  0x4e   :  { %467 = vmatmul.msk.bf16.gmra.mxu1 %vm183_vm1, %v402_v54 }
  0x51   :  { %235 = vmatmul.bf16.gmra.mxu0 %v390_v59 }
  0x52   :  { %255 = vmatmul.bf16.gmra.mxu2 %v422_v60 }
  0x8b   :  { %v270_v61 = vpop.f32.mrf.mxu1 }
  0x92   :  { %v295_v15 = vpop.f32.mrf.mxu3 }
  0x93   :  { %v272_v62 = vpop.f32.mrf.mxu1 }
  0x9a   :  { %v297_v26 = vpop.f32.mrf.mxu3 }
  0x9b   :  { %v275_v63 = vpop.f32.mrf.mxu1 }
  0x9e   :  { %v221_v1 = vpop.f32.mrf.mxu0 }
  0x9f   :  { %v222_v2 = vadd.f32 %v664_v0, %v221_v1 }
  0xa1   :  { %v271_v3 = vadd.f32 %v270_v61, %v222_v2 }
  0xa2   :  { %v300_v40 = vpop.f32.mrf.mxu3 }
  0xa3   :  { %v277_v4 = vpop.f32.mrf.mxu1  ;;  %v310_v5 = vmax.f32 %v271_v3, 0.0 }
  0xa5   :  { %v326_v6 = vpack.c.bf16 %v310_v5, %v310_v5  ;;  %v241_v7 = vpop.f32.mrf.mxu2 }
  0xa6   :  { %v223_v8 = vpop.f32.mrf.mxu0  ;;  %v242_v51 = vadd.f32 %v664_v0, %v241_v7 }
  0xa7   :  { %343 = vst.msk [vmem:[%s749_s3] sm:$0xf] %vm342_vm2, %v326_v6  ;;  %v224_v9 = vadd.f32 %v664_v0, %v223_v8 }
  0xa9   :  { %v273_v10 = vadd.f32 %v272_v62, %v224_v9 }
  0xaa   :  { %v302_v56 = vpop.f32.mrf.mxu3 }
  0xab   :  { %v280_v11 = vpop.f32.mrf.mxu1  ;;  %v311_v12 = vmax.f32 %v273_v10, 0.0 }
  0xad   :  { %v327_v13 = vpack.c.bf16 %v311_v12, %v311_v12  ;;  %v243_v14 = vpop.f32.mrf.mxu2 }
  0xae   :  { %v226_v16 = vpop.f32.mrf.mxu0 }
  0xaf   :  { %344 = vst.msk [vmem:[%s749_s3 + $0x4] sm:$0xf] %vm342_vm2, %v327_v13  ;;  %v227_v17 = vadd.f32 %v664_v0, %v226_v16 }
  0xb1   :  { %v276_v18 = vadd.f32 %v275_v63, %v227_v17 }
  0xb2   :  { %v305_v12 = vpop.f32.mrf.mxu3 }
  0xb3   :  { %v282_v19 = vpop.f32.mrf.mxu1  ;;  %v312_v20 = vmax.f32 %v276_v18, 0.0 }
  0xb5   :  { %v328_v21 = vpack.c.bf16 %v312_v20, %v312_v20  ;;  %v246_v22 = vpop.f32.mrf.mxu2 }
  0xb6   :  { %v247_v23 = vadd.f32 %v664_v0, %v246_v22  ;;  %v228_v24 = vpop.f32.mrf.mxu0 }
  0xb7   :  { %345 = vst.msk [vmem:[%s749_s3 + $0x8] sm:$0xf] %vm342_vm2, %v328_v21  ;;  %v229_v25 = vadd.f32 %v664_v0, %v228_v24 }
  0xb8   :  { %v296_v27 = vadd.f32 %v295_v15, %v247_v23 }
  0xb9   :  { %v278_v28 = vadd.f32 %v277_v4, %v229_v25  ;;  %v244_v4 = vadd.f32 %v664_v0, %v243_v14 }
  0xba   :  { %v320_v29 = vmax.f32 %v296_v27, 0.0  ;;  %v307_v27 = vpop.f32.mrf.mxu3 }
  0xbb   :  { %v285_v30 = vpop.f32.mrf.mxu1  ;;  %v313_v31 = vmax.f32 %v278_v28, 0.0 }
  0xbc   :  { %v336_v32 = vpack.c.bf16 %v320_v29, %v320_v29 }
  0xbd   :  { %v329_v33 = vpack.c.bf16 %v313_v31, %v313_v31  ;;  %v248_v34 = vpop.f32.mrf.mxu2 }
  0xbe   :  { %353 = vst.msk [vmem:[%s749_s3 + $0x28] sm:$0xf] %vm342_vm2, %v336_v32  ;;  %v249_v35 = vadd.f32 %v664_v0, %v248_v34  ;;  %v231_v36 = vpop.f32.mrf.mxu0 }
  0xbf   :  { %346 = vst.msk [vmem:[%s749_s3 + $0xc] sm:$0xf] %vm342_vm2, %v329_v33  ;;  %v232_v37 = vadd.f32 %v664_v0, %v231_v36 }
  0xc0   :  { %v298_v38 = vadd.f32 %v297_v26, %v249_v35 }
  0xc1   :  { %v281_v39 = vadd.f32 %v280_v11, %v232_v37 }
  0xc2   :  { %v321_v41 = vmax.f32 %v298_v38, 0.0 }
  0xc3   :  { %v287_v42 = vpop.f32.mrf.mxu1  ;;  %v314_v43 = vmax.f32 %v281_v39, 0.0 }
  0xc4   :  { %v337_v44 = vpack.c.bf16 %v321_v41, %v321_v41 }
  0xc5   :  { %v330_v45 = vpack.c.bf16 %v314_v43, %v314_v43  ;;  %v251_v46 = vpop.f32.mrf.mxu2 }
  0xc6   :  { %354 = vst.msk [vmem:[%s749_s3 + $0x2c] sm:$0xf] %vm342_vm2, %v337_v44  ;;  %v252_v47 = vadd.f32 %v664_v0, %v251_v46  ;;  %v233_v48 = vpop.f32.mrf.mxu0 }
  0xc7   :  { %347 = vst.msk [vmem:[%s749_s3 + $0x10] sm:$0xf] %vm342_vm2, %v330_v45  ;;  %v234_v49 = vadd.f32 %v664_v0, %v233_v48 }
  0xc8   :  { %v301_v50 = vadd.f32 %v300_v40, %v252_v47 }
  0xc9   :  { %v283_v52 = vadd.f32 %v282_v19, %v234_v49 }
  0xca   :  { %v322_v53 = vmax.f32 %v301_v50, 0.0 }
  0xcb   :  { %v290_v54 = vpop.f32.mrf.mxu1  ;;  %v315_v55 = vmax.f32 %v283_v52, 0.0 }
  0xcc   :  { %v291_v57 = vadd.f32 %v290_v54, %v242_v51  ;;  %v338_v58 = vpack.c.bf16 %v322_v53, %v322_v53 }
  0xcd   :  { %v331_v59 = vpack.c.bf16 %v315_v55, %v315_v55  ;;  %v253_v61 = vpop.f32.mrf.mxu2 }
  0xce   :  { %v318_v60 = vmax.f32 %v291_v57, 0.0  ;;  %355 = vst.msk [vmem:[%s749_s3 + $0x30] sm:$0xf] %vm342_vm2, %v338_v58  ;;  %v254_v62 = vadd.f32 %v664_v0, %v253_v61  ;;  %v236_v63 = vpop.f32.mrf.mxu0 }
  0xcf   :  { %348 = vst.msk [vmem:[%s749_s3 + $0x14] sm:$0xf] %vm342_vm2, %v331_v59  ;;  %v237_v2 = vadd.f32 %v664_v0, %v236_v63 }
  0xd0   :  { %v334_v1 = vpack.c.bf16 %v318_v60, %v318_v60  ;;  %v303_v3 = vadd.f32 %v302_v56, %v254_v62 }
  0xd1   :  { %v286_v5 = vadd.f32 %v285_v30, %v237_v2 }
  0xd2   :  { %351 = vst.msk [vmem:[%s749_s3 + $0x20] sm:$0xf] %vm342_vm2, %v334_v1  ;;  %v323_v6 = vmax.f32 %v303_v3, 0.0 }
  0xd3   :  { %v292_v7 = vpop.f32.mrf.mxu1  ;;  %v316_v8 = vmax.f32 %v286_v5, 0.0 }
  0xd4   :  { %v293_v9 = vadd.f32 %v292_v7, %v244_v4  ;;  %v339_v10 = vpack.c.bf16 %v323_v6, %v323_v6 }
  0xd5   :  { %v332_v11 = vpack.c.bf16 %v316_v8, %v316_v8  ;;  %v256_v15 = vpop.f32.mrf.mxu2 }
  0xd6   :  { %v319_v13 = vmax.f32 %v293_v9, 0.0  ;;  %356 = vst.msk [vmem:[%s749_s3 + $0x34] sm:$0xf] %vm342_vm2, %v339_v10  ;;  %v257_v14 = vadd.f32 %v664_v0, %v256_v15  ;;  %v238_v16 = vpop.f32.mrf.mxu0 }
  0xd7   :  { %349 = vst.msk [vmem:[%s749_s3 + $0x18] sm:$0xf] %vm342_vm2, %v332_v11  ;;  %v239_v18 = vadd.f32 %v664_v0, %v238_v16 }
  0xd8   :  { %v335_v17 = vpack.c.bf16 %v319_v13, %v319_v13  ;;  %v306_v19 = vadd.f32 %v305_v12, %v257_v14 }
  0xd9   :  { %v288_v20 = vadd.f32 %v287_v42, %v239_v18 }
  0xda   :  { %352 = vst.msk [vmem:[%s749_s3 + $0x24] sm:$0xf] %vm342_vm2, %v335_v17  ;;  %v324_v21 = vmax.f32 %v306_v19, 0.0 }
  0xdb   :  { %v317_v22 = vmax.f32 %v288_v20, 0.0 }
  0xdc   :  { %v340_v23 = vpack.c.bf16 %v324_v21, %v324_v21 }
  0xdd   :  { %v333_v24 = vpack.c.bf16 %v317_v22, %v317_v22  ;;  %v258_v25 = vpop.f32.mrf.mxu2 }
  0xde   :  { %357 = vst.msk [vmem:[%s749_s3 + $0x38] sm:$0xf] %vm342_vm2, %v340_v23  ;;  %v259_v26 = vadd.f32 %v664_v0, %v258_v25 }
  0xdf   :  { %350 = vst.msk [vmem:[%s749_s3 + $0x1c] sm:$0xf] %vm342_vm2, %v333_v24 }
  0xe0   :  { %v308_v28 = vadd.f32 %v307_v27, %v259_v26 }
  0xe2   :  { %v325_v29 = vmax.f32 %v308_v28, 0.0 }
  0xe4   :  { %v341_v30 = vpack.c.bf16 %v325_v29, %v325_v29 }
  0xe6   :  { %358 = vst.msk [vmem:[%s749_s3 + $0x3c] sm:$0xf] %vm342_vm2, %v341_v30 }

</bundles_post_ra>
